<compile_context>
chip_gen: v7x
topology: tpu7x:2x2x1
jax: 0.10.0
libtpu: 0.0.40
codegen_flags: <defaults>
</compile_context>

<pallas_src>
import functools

import jax
import jax.numpy as jnp
from jax.experimental import pallas as pl
from jax.experimental.pallas import tpu as pltpu


def _round_up(x: int, m: int) -> int:
    return ((x + m - 1) // m) * m


def _robust_ce_kernel(pred_ref, target_ref, tt_ref, out_ref, *,
                      is_backward: bool, eps: float, tile_n: int,
                      n_rows: int, mask_rows: bool):
    """One row-tile: contribution of (tile_n, C) rows to sum_N sum_C t * logp.

    Emits an (8, C) partial-sum block per tile (rows folded onto 8 sublanes with
    plain vector adds).  Cross-lane reduction, negation and the mean happen once
    in the wrapper, keeping per-step XLU/scalar work off the critical path and
    letting the grid axis be 'parallel'.
    """
    pred = pred_ref[...].astype(jnp.float32)     # element-wise math in f32
    tgt = target_ref[...].astype(jnp.float32)
    tt = tt_ref[...]                             # (C, C) f32 == T^T (resident)

    if mask_rows:
        # Last tile may extend past N: its out-of-bounds rows contain garbage
        # (possibly NaN/Inf), so select them to 0 before any arithmetic.
        row0 = pl.program_id(0) * tile_n
        rows = row0 + jax.lax.broadcasted_iota(jnp.int32, (tile_n, 1), 0)
        valid = rows < n_rows                    # (tile_n, 1) bool, broadcasts over C
        pred = jnp.where(valid, pred, 0.0)
        tgt = jnp.where(valid, tgt, 0.0)

    if is_backward:
        # target' = target @ T_inv^T   (tt already holds T_inv^T)
        t2 = jnp.dot(tgt, tt, preferred_element_type=jnp.float32)
        m = jnp.max(pred, axis=-1, keepdims=True)
        shifted = pred - m
        lse = jnp.log(jnp.sum(jnp.exp(shifted), axis=-1, keepdims=True))
        contrib = t2 * (shifted - lse)           # masked rows: t2 == 0 -> contrib == 0
    else:
        m = jnp.max(pred, axis=-1, keepdims=True)
        e = jnp.exp(pred - m)
        denom = jnp.sum(e, axis=-1, keepdims=True)
        sm = jnp.clip(e / denom, eps, 1.0 - eps)           # divide hidden under DMA
        mixed = jnp.dot(sm, tt, preferred_element_type=jnp.float32)
        contrib = tgt * jnp.log(mixed)           # masked rows: tgt == 0, log finite

    c = contrib.shape[-1]
    # Fold rows onto 8 sublanes with plain vector adds; no cross-lane reduce here.
    partial = contrib.reshape(tile_n // 8, 8, c).sum(axis=0)   # (8, C)
    out_ref[0] = partial


@functools.partial(jax.jit, static_argnames=("robust_method", "eps", "tile_n"))
def robust_cross_entropy_loss(pred, target, T_buf, *, robust_method="backward",
                              eps=1e-6, tile_n=None):
    """pred, target: (..., C) ; T_buf: (C, C) (already inverted for 'backward')."""
    assert robust_method in ("forward", "backward")
    C = pred.shape[-1]
    assert T_buf.shape == (C, C)
    pred2 = pred.reshape(-1, C)
    target2 = target.reshape(-1, C)
    N = pred2.shape[0]

    # ---- hoist T^T once (tiny, f32); kernel computes x @ Tt == torch.inner(x, T).
    Tt = jnp.asarray(T_buf, dtype=jnp.float32).T

    # ---- row-tile choice: biggest tile that keeps double-buffered inputs plus the
    # f32 temporaries inside a ~24 MiB scoped-VMEM budget (safe for v7x's 64 MiB).
    c_lane = _round_up(C, 128)                   # VMEM lane padding for budgeting
    itm_p = pred2.dtype.itemsize
    itm_t = target2.dtype.itemsize
    t_bytes = 2 * _round_up(C, 8) * c_lane * 4   # resident T^T (double-buffered)
    if tile_n is None:
        per_row = c_lane * (2 * itm_p + 2 * itm_t + 7 * 4)   # dbl-buf inputs + f32 temps
        budget = 24 * 1024 * 1024 - t_bytes
        tile_n = max(8, min(4096, (max(budget, 0) // per_row) // 8 * 8))
    tile_n = max(8, min(_round_up(int(tile_n), 8), _round_up(N, 8)))

    num_tiles = pl.cdiv(N, tile_n)
    mask_rows = (N % tile_n) != 0                # static: tail-mask only when needed

    # ---- explicit VMEM limit (double-buffered inputs + resident T + temporaries).
    in_bytes = 2 * tile_n * c_lane * (itm_p + itm_t)
    tmp_bytes = 7 * tile_n * c_lane * 4
    out_bytes = 2 * 8 * c_lane * 4
    need = in_bytes + t_bytes + tmp_bytes + out_bytes
    vmem_limit = int(min(max(need + need // 4, 16 * 1024 * 1024), 48 * 1024 * 1024))

    kernel = functools.partial(
        _robust_ce_kernel,
        is_backward=(robust_method == "backward"),
        eps=float(eps),
        tile_n=tile_n,
        n_rows=N,
        mask_rows=mask_rows,
    )

    partials = pl.pallas_call(
        kernel,
        out_shape=jax.ShapeDtypeStruct((num_tiles, 8, C), jnp.float32),
        grid_spec=pltpu.PrefetchScalarGridSpec(
            num_scalar_prefetch=0,
            grid=(num_tiles,),
            in_specs=[
                pl.BlockSpec((tile_n, C), lambda i: (i, 0)),   # pred  (full class dim)
                pl.BlockSpec((tile_n, C), lambda i: (i, 0)),   # target
                pl.BlockSpec((C, C), lambda i: (0, 0)),        # T^T, resident
            ],
            out_specs=pl.BlockSpec((1, 8, C), lambda i: (i, 0, 0)),
        ),
        compiler_params=pltpu.CompilerParams(
            dimension_semantics=("parallel",),   # independent per-tile partials
            vmem_limit_bytes=vmem_limit,
        ),
    )(pred2, target2, Tt)

    # Final cross-lane/tile reduction, negation and mean: tiny, done in the wrapper.
    return -jnp.sum(partials) / jnp.float32(N)


class RobustCrossEntropyLossPallas:
    """Pallas port of RobustCrossEntropyLoss."""

    def __init__(self, T, robust_method: str = "backward"):
        assert robust_method in ("forward", "backward")
        self.robust_method = robust_method
        T = jnp.asarray(T, dtype=jnp.float32)
        # init-time buffer setup, mirrors torch.linalg.inv(T) register_buffer
        self.T = jnp.linalg.inv(T) if robust_method == "backward" else T

    def __call__(self, pred, target, eps: float = 1e-6):
        target = target.astype(self.T.dtype)
        return robust_cross_entropy_loss(
            pred, target, self.T,
            robust_method=self.robust_method, eps=eps)


def _reference(pred, target, T_buf, robust_method, eps=1e-6):
    """Pure-JAX reference mirroring the PyTorch module (T_buf already inverted
    for the backward method)."""
    target = target.astype(jnp.float32)
    if robust_method == "backward":
        t2 = target @ T_buf.T
        lp = jax.nn.log_softmax(pred, axis=-1)
        return -jnp.mean(jnp.sum(t2 * lp, axis=-1))
    p = jnp.clip(jax.nn.softmax(pred, axis=-1), eps, 1.0 - eps)
    lp = jnp.log(p @ T_buf.T)
    return -jnp.mean(jnp.sum(target * lp, axis=-1))


if __name__ == "__main__":
    key = jax.random.PRNGKey(0)
    N, C = 32, 16  # small shapes: 32 samples, 16 classes

    # Deterministic row-stochastic noise transition matrix:
    #   T = (1 - noise) * I + noise / (C - 1) * (1 - I)
    noise = 0.2
    eye = jnp.eye(C, dtype=jnp.float32)
    T = (1.0 - noise) * eye + (noise / (C - 1)) * (1.0 - eye)

    k_pred, k_lbl = jax.random.split(key)
    pred = jax.random.normal(k_pred, (N, C), dtype=jnp.float32)
    labels = jax.random.randint(k_lbl, (N,), 0, C)
    target = jax.nn.one_hot(labels, C, dtype=jnp.float32)

    # backward (default) path
    loss_bwd = RobustCrossEntropyLossPallas(T, "backward")(pred, target)
    # forward path
    loss_fwd = RobustCrossEntropyLossPallas(T, "forward")(pred, target)
    jax.block_until_ready((loss_bwd, loss_fwd))

    # correctness check against a pure-JAX reference of the torch module
    ref_bwd = _reference(pred, target, jnp.linalg.inv(T), "backward")
    ref_fwd = _reference(pred, target, T, "forward")
    assert jnp.allclose(loss_bwd, ref_bwd, rtol=1e-3, atol=1e-4), (loss_bwd, ref_bwd)
    assert jnp.allclose(loss_fwd, ref_fwd, rtol=1e-3, atol=1e-4), (loss_fwd, ref_fwd)

    print("KERNEL_OK")
</pallas_src>

<mosaic_0001>
module attributes {stable_mosaic.version = 11 : i64} {
  func.func @_robust_ce_kernel(%arg0: i32, %arg1: memref<32x16xf32, #tpu.memory_space<vmem>>, %arg2: memref<32x16xf32, #tpu.memory_space<vmem>>, %arg3: memref<16x16xf32, #tpu.memory_space<vmem>>, %arg4: memref<1x8x16xf32, #tpu.memory_space<vmem>>) attributes {dimension_semantics = [#tpu.dimension_semantics<parallel>], iteration_bounds = array<i64: 1>, scalar_prefetch = 0 : i64, scratch_operands = 0 : i64, tpu.core_type = #tpu.core_type<tc>, window_params = [{transform_indices = @transform_0, window_bounds = array<i64: 32, 16>}, {transform_indices = @transform_1, window_bounds = array<i64: 32, 16>}, {pipeline_mode = #tpu.pipeline_mode<synchronous>, transform_indices = @transform_2, window_bounds = array<i64: 16, 16>}, {transform_indices = @transform_3, window_bounds = array<i64: 1, 8, 16>}]} {
    %c0 = arith.constant 0 : index
    %c0_0 = arith.constant 0 : index
    %0 = vector.load %arg1[%c0, %c0_0] : memref<32x16xf32, #tpu.memory_space<vmem>>, vector<32x16xf32>
    %c0_1 = arith.constant 0 : index
    %c0_2 = arith.constant 0 : index
    %1 = vector.load %arg2[%c0_1, %c0_2] : memref<32x16xf32, #tpu.memory_space<vmem>>, vector<32x16xf32>
    %c0_3 = arith.constant 0 : index
    %c0_4 = arith.constant 0 : index
    %2 = vector.load %arg3[%c0_3, %c0_4] : memref<16x16xf32, #tpu.memory_space<vmem>>, vector<16x16xf32>
    %cst = arith.constant dense<0.000000e+00> : vector<32x16xf32>
    %3 = tpu.matmul %1, %2, %cst {dimension_numbers = #tpu.dot_dimension_numbers<[1], [0], [0], [1], [0, 0, 1, 1], [], []>} : vector<32x16xf32>, vector<16x16xf32>, vector<32x16xf32> -> vector<32x16xf32>
    %cst_5 = arith.constant dense<0xFF800000> : vector<32xf32>
    %4 = vector.multi_reduction <maximumf>, %0, %cst_5 [1] : vector<32x16xf32> to vector<32xf32>
    %5 = vector.shape_cast %4 : vector<32xf32> to vector<32x1xf32>
    %6 = vector.broadcast %5 : vector<32x1xf32> to vector<32x16xf32>
    %7 = arith.subf %0, %6 : vector<32x16xf32>
    %8 = math.exp %7 : vector<32x16xf32>
    %cst_6 = arith.constant dense<0.000000e+00> : vector<32xf32>
    %9 = vector.multi_reduction <add>, %8, %cst_6 [1] : vector<32x16xf32> to vector<32xf32>
    %10 = vector.shape_cast %9 : vector<32xf32> to vector<32x1xf32>
    %11 = math.log %10 : vector<32x1xf32>
    %12 = vector.broadcast %11 : vector<32x1xf32> to vector<32x16xf32>
    %13 = arith.subf %7, %12 : vector<32x16xf32>
    %14 = arith.mulf %3, %13 : vector<32x16xf32>
    %15 = vector.shape_cast %14 : vector<32x16xf32> to vector<4x8x16xf32>
    %cst_7 = arith.constant dense<0.000000e+00> : vector<8x16xf32>
    %16 = vector.multi_reduction <add>, %15, %cst_7 [0] : vector<4x8x16xf32> to vector<8x16xf32>
    %c0_8 = arith.constant 0 : index
    %c0_9 = arith.constant 0 : index
    %c0_10 = arith.constant 0 : index
    %17 = vector.load %arg4[%c0_8, %c0_9, %c0_10] : memref<1x8x16xf32, #tpu.memory_space<vmem>>, vector<1x8x16xf32>
    %18 = vector.shape_cast %17 : vector<1x8x16xf32> to vector<8x16xf32>
    %19 = vector.shape_cast %16 : vector<8x16xf32> to vector<1x8x16xf32>
    tpu.vector_store %arg4[%c0_8, %c0_9, %c0_10], %19 {strides = array<i32>} : memref<1x8x16xf32, #tpu.memory_space<vmem>>, vector<1x8x16xf32>,
    return
  }
  func.func @transform_0(%arg0: i32) -> (i32, i32) {
    %c0_i32 = arith.constant 0 : i32
    %c0_i32_0 = arith.constant 0 : i32
    return %arg0, %c0_i32 : i32, i32
  }
  func.func @transform_1(%arg0: i32) -> (i32, i32) {
    %c0_i32 = arith.constant 0 : i32
    %c0_i32_0 = arith.constant 0 : i32
    return %arg0, %c0_i32 : i32, i32
  }
  func.func @transform_2(%arg0: i32) -> (i32, i32) {
    %c0_i32 = arith.constant 0 : i32
    %c0_i32_0 = arith.constant 0 : i32
    %c0_i32_1 = arith.constant 0 : i32
    return %c0_i32, %c0_i32_0 : i32, i32
  }
  func.func @transform_3(%arg0: i32) -> (i32, i32, i32) {
    %c0_i32 = arith.constant 0 : i32
    %c0_i32_0 = arith.constant 0 : i32
    %c0_i32_1 = arith.constant 0 : i32
    return %arg0, %c0_i32, %c0_i32_0 : i32, i32, i32
  }
}

</mosaic_0001>

<bundles_post_ra>
// kernel: robust_cross_entropy_loss.1
= control target key start
LH: loop header
LB: loop body
LE: loop exit
PB: predicated region body
PF: predicated region fallthrough
CT: control target
= control target key end

     0   :  { %vm24_vm0 = vcmask 130048   ;;  %s298_s0 = inlined_call_operand.vmem [shape: f32[32,16], index: 0, kind: input, shape index: {}]   ;;  %s299_s2 = inlined_call_operand.vmem [shape: f32[16,16], index: 2, kind: input, shape index: {}]   ;;  %s300_s1 = inlined_call_operand.vmem [shape: f32[32,16], index: 1, kind: input, shape index: {}]   ;;  %s301_s3 = inlined_call_operand.vmem [shape: f32[1,8,16], index: 3, kind: output, shape index: {}]  }
   0x1   :  { %v14_v0 = vld [vmem:[%s298_s0] sm:$0xff]  ;;  %v16_v1 = vld [vmem:[%s298_s0 + $0x10] sm:$0xff]  ;;  %v15_v2 = vld [vmem:[%s298_s0 + $0x8] sm:$0xff] }
   0x2   :  { %v122_v3 = vsel %vm24_vm0, %v14_v0, -inf  ;;  %v128_v4 = vsel %vm24_vm0, %v16_v1, -inf  ;;  %v17_v5 = vld [vmem:[%s298_s0 + $0x18] sm:$0xff]  ;;  %v22_v6 = vld [vmem:[%s299_s2] sm:$0xff]  ;;  %v23_v7 = vld [vmem:[%s299_s2 + $0x8] sm:$0xff]  ;;  %v125_v11 = vsel %vm24_vm0, %v15_v2, -inf }
   0x3   :  { %123 = vmax.xlane.f32.xlu0 %v122_v3  ;;  %129 = vmax.xlane.f32.xlu1 %v128_v4  ;;  %v206_v8 = vpack.c.bf16 %v23_v7, %v22_v6  ;;  %v18_v9 = vld [vmem:[%s300_s1] sm:$0xff]  ;;  %v20_v10 = vld [vmem:[%s300_s1 + $0x10] sm:$0xff]  ;;  %v131_v12 = vsel %vm24_vm0, %v17_v5, -inf  ;;  %v19_v13 = vld [vmem:[%s300_s1 + $0x8] sm:$0xff] }
   0x4   :  { %200 = vmatprep.mubr.msk.f32.mxu0 %vm24_vm0, %v18_v9  ;;  %203 = vmatprep.mubr.msk.f32.mxu1 %vm24_vm0, %v20_v10  ;;  %v21_v14 = vld [vmem:[%s300_s1 + $0x18] sm:$0xff] }
   0x5   :  { %207 = vmatprep.subr.bf16.mxu0 %v206_v8  ;;  %210 = vmatprep.subr.bf16.mxu1 %v206_v8 }
   0x6   :  { %209 = vmatpush3.bf16.msra.mxu0 %v206_v8  ;;  %211 = vmatpush3.bf16.msra.mxu1 %v206_v8 }
   0x7   :  { %126 = vmax.xlane.f32.xlu0 %v125_v11  ;;  %132 = vmax.xlane.f32.xlu1 %v131_v12 }
   0x9   :  { %201 = vmatmul.mubr.msk.f32.vlgmr.msra.gmra.mrb[0].mxu0 %vm24_vm0, %v19_v13  ;;  %204 = vmatmul.mubr.msk.f32.vlgmr.msra.gmra.mrb[0].mxu1 %vm24_vm0, %v21_v14 }
  0x90   :  { %v124_v15 = vpop.xlane.xlu0 %123  ;;  %v130_v16 = vpop.xlane.xlu1 %129 }
  0x91   :  { %v134_v17 = vsub.f32 %v14_v0, %v124_v15  ;;  %v136_v18 = vsub.f32 %v16_v1, %v130_v16 }
  0x93   :  { %v138_v19 = vmul.f32 1.442695, %v134_v17  ;;  %v142_v20 = vmul.f32 1.442695, %v136_v18 }
  0x94   :  { %v127_v21 = vpop.xlane.xlu0 %126  ;;  %v133_v22 = vpop.xlane.xlu1 %132 }
  0x95   :  { %212 = vpow2.f32 %v138_v19  ;;  %v135_v23 = vsub.f32 %v15_v2, %v127_v21  ;;  %v137_v24 = vsub.f32 %v17_v5, %v133_v22 }
  0x96   :  { %214 = vpow2.f32 %v142_v20 }
  0x97   :  { %v140_v25 = vmul.f32 1.442695, %v135_v23  ;;  %v144_v26 = vmul.f32 1.442695, %v137_v24 }
  0x99   :  { %216 = vpow2.f32 %v140_v25 }
  0x9a   :  { %218 = vpow2.f32 %v144_v26 }
  0x9f   :  { %v213_v27 = vpop.eup %212 }
  0xa0   :  { %v215_v28 = vpop.eup %214  ;;  %v146_v29 = vsel %vm24_vm0, %v213_v27, 0.0 }
  0xa1   :  { %147 = vadd.xlane.f32.xlu0 %v146_v29  ;;  %v152_v30 = vsel %vm24_vm0, %v215_v28, 0.0 }
  0xa3   :  { %v217_v31 = vpop.eup %216 }
  0xa4   :  { %v219_v32 = vpop.eup %218  ;;  %v149_v33 = vsel %vm24_vm0, %v217_v31, 0.0 }
  0xa5   :  { %153 = vadd.xlane.f32.xlu0 %v152_v30  ;;  %150 = vadd.xlane.f32.xlu1 %v149_v33  ;;  %v155_v34 = vsel %vm24_vm0, %v219_v32, 0.0 }
  0xa9   :  { %156 = vadd.xlane.f32.xlu1 %v155_v34 }
  0xdc   :  { %v202_v35 = vpop.f32.mrb[0].mxu0  ;;  %v205_v36 = vpop.f32.mrb[0].mxu1 }
  0xdd   :  { %v103_v37 = vpop.f32.mrb[1].mxu0  ;;  %v113_v38 = vpop.f32.mrb[1].mxu1 }
 0x12e   :  { %v148_v39 = vpop.xlane.xlu0 %147 }
 0x12f   :  { %220 = vlog2.f32 %v148_v39 }
 0x132   :  { %v151_v40 = vpop.xlane.xlu1 %150  ;;  %v154_v41 = vpop.xlane.xlu0 %153 }
 0x133   :  { %222 = vlog2.f32 %v151_v40 }
 0x134   :  { %224 = vlog2.f32 %v154_v41 }
 0x136   :  { %v157_v42 = vpop.xlane.xlu1 %156 }
 0x137   :  { %226 = vlog2.f32 %v157_v42 }
 0x139   :  { %v221_v43 = vpop.eup %220 }
 0x13a   :  { %v159_v44 = vmul.f32 0.6931472, %v221_v43 }
 0x13c   :  { %v166_v45 = vsub.f32 %v134_v17, %v159_v44 }
 0x13d   :  { %v223_v46 = vpop.eup %222 }
 0x13e   :  { %v225_v47 = vpop.eup %224  ;;  %v161_v48 = vmul.f32 0.6931472, %v223_v46  ;;  %v170_v51 = vmul.f32 %v166_v45, %v103_v37 }
 0x13f   :  { %v163_v49 = vmul.f32 0.6931472, %v225_v47 }
 0x140   :  { %v167_v50 = vsub.f32 %v135_v23, %v161_v48  ;;  %v174_v58 = vsel %vm24_vm0, %v170_v51, 0.0 }
 0x141   :  { %v227_v52 = vpop.eup %226  ;;  %v168_v53 = vsub.f32 %v136_v18, %v163_v49 }
 0x142   :  { %v165_v54 = vmul.f32 0.6931472, %v227_v52  ;;  %v171_v55 = vmul.f32 %v202_v35, %v167_v50 }
 0x143   :  { %v172_v56 = vmul.f32 %v168_v53, %v113_v38 }
 0x144   :  { %v175_v57 = vsel %vm24_vm0, %v171_v55, 0.0  ;;  %v169_v59 = vsub.f32 %v137_v24, %v165_v54 }
 0x145   :  { %v176_v60 = vadd.f32 %v175_v57, %v174_v58  ;;  %v177_v62 = vsel %vm24_vm0, %v172_v56, 0.0 }
 0x146   :  { %v173_v61 = vmul.f32 %v205_v36, %v169_v59 }
 0x147   :  { %v178_v63 = vadd.f32 %v177_v62, %v176_v60 }
 0x148   :  { %v179_v0 = vsel %vm24_vm0, %v173_v61, 0.0 }
 0x149   :  { %v180_v1 = vadd.f32 %v179_v0, %v178_v63 }
 0x14b   :  { %181 = vst.msk [vmem:[%s301_s3] sm:$0xff] %vm24_vm0, %v180_v1 }

</bundles_post_ra>
